<compile_context>
chip_gen: v7x
topology: tpu7x:2x2x1
jax: 0.10.0
libtpu: 0.0.40
codegen_flags: <defaults>
</compile_context>

<pallas_src>
import numpy as np

import jax
import jax.numpy as jnp
from jax.experimental import pallas as pl
from jax.experimental.pallas import tpu as pltpu


# ---------------------------------------------------------------------------
# Synthetic config (stands in for configs.sub_band_decoder / bands_num_in_groups).
# ---------------------------------------------------------------------------
CHANNELS = 16  # channels of `feature` and of each sub_encode
DECODER_CONFIG = (
    dict(bands=16, out_features=4),    # 16 bands -> 16*4  = 64 freqs
    dict(bands=8,  out_features=8),    #  8 bands -> 8*8   = 64 freqs
    dict(bands=8,  out_features=16),   #  8 bands -> 8*16  = 128 freqs
)
TOTAL_BANDS = sum(cfg["bands"] for cfg in DECODER_CONFIG)                       # 32
FULL_FREQ = sum(cfg["bands"] * cfg["out_features"] for cfg in DECODER_CONFIG)   # 256
K_TOTAL = CHANNELS * TOTAL_BANDS + sum(CHANNELS * cfg["bands"]
                                       for cfg in DECODER_CONFIG)               # 1024


def _round_up(x, m):
    return (x + m - 1) // m * m


# ---------------------------------------------------------------------------
# Pallas kernel: single fused matmul + bias + ReLU for the whole decoder.
# ---------------------------------------------------------------------------
def _decoder_kernel(x_ref, w_ref, b_ref, o_ref):
    # x: (tm, K) bf16, w: (K, F) bf16, b: (1, F) f32, o: (tm, F) out_dtype.
    acc = jnp.dot(x_ref[...], w_ref[...], preferred_element_type=jnp.float32)
    acc = acc + b_ref[...]
    o_ref[...] = jnp.maximum(acc, 0.0).astype(o_ref.dtype)


# ---------------------------------------------------------------------------
# Parameter handling: per-block nn.Linear params -> ONE block-banded dense matrix.
# ---------------------------------------------------------------------------
def init_params(key):
    """Per-block Linear params, PyTorch-style uniform init. weight: (f_g, 2C), bias: (f_g,)."""
    params = []
    fan_in = 2 * CHANNELS
    bound = 1.0 / float(fan_in) ** 0.5
    for i, cfg in enumerate(DECODER_CONFIG):
        kw, kb = jax.random.split(jax.random.fold_in(key, i))
        f_g = cfg["out_features"]
        w = jax.random.uniform(kw, (f_g, fan_in), jnp.float32, -bound, bound)
        b = jax.random.uniform(kb, (f_g,), jnp.float32, -bound, bound)
        params.append((w, b))
    return params


def build_dense_params(params):
    """Bake slicing + channel-concat + per-band Linear + output-concat into ONE dense
    (K_TOTAL, FULL_FREQ) matrix (computed ONCE, outside the hot path).

    Row layout of the fused contraction axis K (matches the wrapper's activation concat):
      rows [0, C*TOTAL_BANDS)                : feat_flat[b, c*TOTAL_BANDS + band]
      rows [enc_off_g, enc_off_g + C*n_g)    : enc_g_flat[b, c*n_g + k]
    Column layout: out[b, off_g + k*f_g + j].
    """
    C = CHANNELS
    W = np.zeros((K_TOTAL, FULL_FREQ), np.float32)
    bias = np.zeros((FULL_FREQ,), np.float32)
    out_off = 0
    band_off = 0
    enc_off = C * TOTAL_BANDS
    for (w, b), cfg in zip(params, DECODER_CONFIG):
        n_g, f_g = cfg["bands"], cfg["out_features"]
        w = np.asarray(w, np.float32)    # (f_g, 2C)
        b = np.asarray(b, np.float32)    # (f_g,)
        for k in range(n_g):
            cols = slice(out_off + k * f_g, out_off + (k + 1) * f_g)
            bias[cols] = b
            for c in range(C):
                W[c * TOTAL_BANDS + band_off + k, cols] = w[:, c]        # feature half
                W[enc_off + c * n_g + k, cols] = w[:, C + c]             # sub-encode half
        out_off += n_g * f_g
        band_off += n_g
        enc_off += C * n_g
    # bf16 weight (halves HBM/VMEM for the resident matrix), f32 bias (tiny).
    return (jnp.asarray(W, jnp.bfloat16),
            jnp.asarray(bias, jnp.float32).reshape(1, FULL_FREQ))


# ---------------------------------------------------------------------------
# SubBandDecoder forward: one fused, row-tiled pallas_call.
# ---------------------------------------------------------------------------
def sub_band_decoder(feature, sub_encodes, dense_params, *, block_rows=1024,
                     out_dtype=jnp.float32):
    """feature: (batch*frames, channels, bands); sub_encodes: list of
    (batch*frames, channels, sub_bands). Returns (batch*frames, full_frequency).

    block_rows: target row-tile (prefer a multiple of 256 on v6e/v7x, 128 on v5e)."""
    W, bias = dense_params
    Bt = feature.shape[0]
    K = int(W.shape[0])
    F_out = int(bias.shape[-1])

    # Single fused activation: free row-major flattens + ONE XLA concat, cast to bf16.
    x = jnp.concatenate(
        [feature.reshape(Bt, -1)] + [e.reshape(Bt, -1) for e in sub_encodes],
        axis=1).astype(jnp.bfloat16)
    assert x.shape[1] == K, (x.shape, K)

    # Row tile: multiple of 16 (bf16 sublane tile), large (block_rows) to amortize the
    # ~0.35 us/step overhead, but capped so the grid has >= 2 steps when possible
    # (v7x has 2 TensorCores; a grid of 1 leaves one idle).
    tm_cap = _round_up(max((Bt + 1) // 2, 16), 16)
    tm = min(_round_up(block_rows, 16), tm_cap)
    Bp = _round_up(Bt, tm)
    if Bp != Bt:
        x = jnp.pad(x, ((0, Bp - Bt), (0, 0)))
    grid = (Bp // tm,)

    # VMEM budget: double-buffered row streams (in + out) + resident weight/bias,
    # with 2x headroom; floor 16 MiB, cap 48 MiB (safe vs v7x's 64 MiB physical).
    out_bytes = jnp.dtype(out_dtype).itemsize
    ws = 2 * tm * (K * 2 + F_out * out_bytes)        # x / out tiles, 2 pipeline buffers
    ws += 2 * (K * F_out * 2 + F_out * 4)            # W (bf16) + bias (f32), 2 buffers
    vmem_limit = int(min(max(2 * ws, 16 << 20), 48 << 20))

    out = pl.pallas_call(
        _decoder_kernel,
        out_shape=jax.ShapeDtypeStruct((Bp, F_out), out_dtype),
        grid=grid,
        in_specs=[
            pl.BlockSpec((tm, K), lambda i: (i, 0)),        # streamed activations
            pl.BlockSpec((K, F_out), lambda i: (0, 0)),     # fused weight (grid-invariant)
            pl.BlockSpec((1, F_out), lambda i: (0, 0)),     # bias (grid-invariant)
        ],
        out_specs=pl.BlockSpec((tm, F_out), lambda i: (i, 0)),  # lane-dense (256 = 2*128)
        compiler_params=pltpu.CompilerParams(
            dimension_semantics=("parallel",),
            vmem_limit_bytes=vmem_limit),
    )(x, W, bias)

    return out[:Bt] if Bp != Bt else out


# ---------------------------------------------------------------------------
# Pure-JAX reference (follows the PyTorch module op-by-op; correctness only).
# ---------------------------------------------------------------------------
def _ref_decoder(feature, sub_encodes, params):
    outs = []
    start = 0
    for (w, b), enc, cfg in zip(params, sub_encodes, DECODER_CONFIG):
        end = start + cfg["bands"]
        f = feature[:, :, start:end]                 # (B, C, n_g)
        x = jnp.concatenate([f, enc], axis=1)        # (B, 2C, n_g)
        x = jnp.transpose(x, (0, 2, 1))              # (B, n_g, 2C)
        y = jnp.einsum("bkc,jc->bkj", x, w,
                       precision=jax.lax.Precision.HIGHEST) + b[None, None, :]
        y = jnp.maximum(y, 0.0)                      # (B, n_g, f_g)
        outs.append(y.reshape(feature.shape[0], -1))
        start = end
    return jnp.concatenate(outs, axis=1)             # (B, full_frequency)


if __name__ == "__main__":
    key = jax.random.PRNGKey(0)
    k_feat, k_enc, k_p = jax.random.split(key, 3)

    batch, frames = 4, 16
    bt = batch * frames  # 64 rows -> tm=32, grid=(2,): both v7x TensorCores get a tile
    feature = jax.random.normal(k_feat, (bt, CHANNELS, TOTAL_BANDS), jnp.float32)
    sub_encodes = [
        jax.random.normal(jax.random.fold_in(k_enc, i),
                          (bt, CHANNELS, cfg["bands"]), jnp.float32)
        for i, cfg in enumerate(DECODER_CONFIG)
    ]

    params = init_params(k_p)
    dense_params = build_dense_params(params)

    out = sub_band_decoder(feature, sub_encodes, dense_params, block_rows=1024)
    out = jax.block_until_ready(out)

    # Correctness check against the pure-JAX f32 reference (bf16 streams -> looser tol).
    ref = _ref_decoder(feature, sub_encodes, params)
    assert out.shape == (bt, FULL_FREQ), out.shape
    assert ref.shape == out.shape
    max_err = float(jnp.max(jnp.abs(out - ref)))
    assert jnp.allclose(out, ref, atol=5e-2, rtol=5e-2), max_err

    print("KERNEL_OK")
</pallas_src>

<mosaic_0001>
module attributes {stable_mosaic.version = 11 : i64} {
  func.func @_decoder_kernel(%arg0: i32, %arg1: memref<32x1024xbf16, #tpu.memory_space<vmem>>, %arg2: memref<1024x256xbf16, #tpu.memory_space<vmem>>, %arg3: memref<1x256xf32, #tpu.memory_space<vmem>>, %arg4: memref<32x256xf32, #tpu.memory_space<vmem>>) attributes {dimension_semantics = [#tpu.dimension_semantics<parallel>], iteration_bounds = array<i64: 2>, scalar_prefetch = 0 : i64, scratch_operands = 0 : i64, tpu.core_type = #tpu.core_type<tc>, window_params = [{transform_indices = @transform_0, window_bounds = array<i64: 32, 1024>}, {pipeline_mode = #tpu.pipeline_mode<synchronous>, transform_indices = @transform_1, window_bounds = array<i64: 1024, 256>}, {pipeline_mode = #tpu.pipeline_mode<synchronous>, transform_indices = @transform_2, window_bounds = array<i64: 1, 256>}, {transform_indices = @transform_3, window_bounds = array<i64: 32, 256>}]} {
    %c0 = arith.constant 0 : index
    %c0_0 = arith.constant 0 : index
    %0 = vector.load %arg1[%c0, %c0_0] : memref<32x1024xbf16, #tpu.memory_space<vmem>>, vector<32x1024xbf16>
    %c0_1 = arith.constant 0 : index
    %c0_2 = arith.constant 0 : index
    %1 = vector.load %arg2[%c0_1, %c0_2] : memref<1024x256xbf16, #tpu.memory_space<vmem>>, vector<1024x256xbf16>
    %cst = arith.constant dense<0.000000e+00> : vector<32x256xf32>
    %2 = tpu.matmul %0, %1, %cst {dimension_numbers = #tpu.dot_dimension_numbers<[1], [0], [0], [1], [0, 0, 1, 1], [], []>} : vector<32x1024xbf16>, vector<1024x256xbf16>, vector<32x256xf32> -> vector<32x256xf32>
    %c0_3 = arith.constant 0 : index
    %c0_4 = arith.constant 0 : index
    %3 = vector.load %arg3[%c0_3, %c0_4] : memref<1x256xf32, #tpu.memory_space<vmem>>, vector<1x256xf32>
    %4 = vector.broadcast %3 : vector<1x256xf32> to vector<32x256xf32>
    %5 = arith.addf %2, %4 : vector<32x256xf32>
    %cst_5 = arith.constant 0.000000e+00 : f32
    %6 = vector.broadcast %cst_5 : f32 to vector<32x256xf32>
    %7 = arith.maximumf %5, %6 : vector<32x256xf32>
    %c0_6 = arith.constant 0 : index
    %c0_7 = arith.constant 0 : index
    %8 = vector.load %arg4[%c0_6, %c0_7] : memref<32x256xf32, #tpu.memory_space<vmem>>, vector<32x256xf32>
    tpu.vector_store %arg4[%c0_6, %c0_7], %7 {strides = array<i32>} : memref<32x256xf32, #tpu.memory_space<vmem>>, vector<32x256xf32>,
    return
  }
  func.func @transform_0(%arg0: i32) -> (i32, i32) {
    %c0_i32 = arith.constant 0 : i32
    %c0_i32_0 = arith.constant 0 : i32
    return %arg0, %c0_i32 : i32, i32
  }
  func.func @transform_1(%arg0: i32) -> (i32, i32) {
    %c0_i32 = arith.constant 0 : i32
    %c0_i32_0 = arith.constant 0 : i32
    %c0_i32_1 = arith.constant 0 : i32
    return %c0_i32, %c0_i32_0 : i32, i32
  }
  func.func @transform_2(%arg0: i32) -> (i32, i32) {
    %c0_i32 = arith.constant 0 : i32
    %c0_i32_0 = arith.constant 0 : i32
    %c0_i32_1 = arith.constant 0 : i32
    return %c0_i32, %c0_i32_0 : i32, i32
  }
  func.func @transform_3(%arg0: i32) -> (i32, i32) {
    %c0_i32 = arith.constant 0 : i32
    %c0_i32_0 = arith.constant 0 : i32
    return %arg0, %c0_i32 : i32, i32
  }
}

</mosaic_0001>

<bundles_post_ra>
// kernel: tpu_custom_call.1
= control target key start
LH: loop header
LB: loop body
LE: loop exit
PB: predicated region body
PF: predicated region fallthrough
CT: control target
= control target key end

     0   :  { %8 = vsyncpa [#allocation3], 0  ;;  %s2271_s0 = inlined_call_operand.hbm [shape: bf16[64,1024], index: 0, kind: input, shape index: {}]   ;;  %s2272_s1 = inlined_call_operand.hbm [shape: bf16[1024,256], index: 1, kind: input, shape index: {}]   ;;  %s2273_s2 = inlined_call_operand.vmem [shape: f32[1,256], index: 2, kind: input, shape index: {}]   ;;  %s2274_s3 = inlined_call_operand.hbm [shape: f32[64,256], index: 3, kind: output, shape index: {}]  }
   0x1   :  { %10 = vsyncpa [#allocation3 + $0x1], 0 }
   0x2   :  { %11 = vsyncpa [#allocation6], 0 }
   0x3   :  { %12 = vsyncpa [#allocation4], 0 }
   0x4   :  { %14 = vsyncpa [#allocation4 + $0x1], 0  ;;  %s2021_s12 = smov 0   ;;  %s2023_s13 = smov 0  }
   0x5   :  { %s2025_s14 = smov 0   ;;  %s2027_s15 = smov 0  }
   0x6 LB: > { %s2042_s16 = sadd.s32 4294967295, %s1990_s15   ;;  %s1409_s17 = sadd.s32 4294967294, %s1990_s15   ;;  %s1990_s15 = sphi %s2027_s15, %s2294_s15   ;;  %s1986_s14 = sphi %s2025_s14, %s2293_s14   ;;  %s1982_s13 = sphi %s2023_s13, %s2292_s13   ;;  %s1978_s12 = sphi %s2021_s12, %s2291_s12  }
   0x7   : > { %p40_p0 = scmp.ne.s32.totalorder %s1982_s13, %s1978_s12  ;;  %p2275_p1 = scmp.eq.s32.totalorder %s2042_s16, 0 }
   0x8   : > { %p112_p3 = scmp.eq.s32.totalorder %s1409_s17, 1  ;;  %p1410_p5 = scmp.ge.s32.totalorder %s1990_s15, 1 }
   0x9   : > { %p2051_p4 = por %p2275_p1, %p40_p0  ;;  %p119_p7 = scmp.lt.s32.totalorder %s1990_s15, 3 }
   0xa   : > { %p2056_p6 = por %p112_p3, %p40_p0  ;;  %s1992_s21 = smov [#allocation5]  }
   0xb   : > { %s2278_s18 = scalar_select %p2051_p4, 1, 0 }
   0xc   : > { %s2279_s19 = scalar_select %p2056_p6, 1, 0 }
   0xd   : > { %p2061_p8 = pnand %p1410_p5, %p119_p7  ;;  %s131_s22 = sshll.u32 %s1992_s21, 4  ;;  %s2065_s22 = int_to_ptr.vmem [resolvable:$true] %s131_s22 }
   0xe   : > { %s2077_s24 = sadd.s32 1, %s1990_s15   ;;  %s27_s25 = sadd.s32 1, %s1986_s14 }
   0xf   : > { %s2280_s20 = scalar_select %p2061_p8, 1, 0 }
  0x10   : > { %p1615_p9 = pneg %p2061_p8  ;;  %s24_s26 = ssub.s32 %s1990_s15, %s2077_s24 }
  0x11   : > { %s1862_s29 = scalar_lea.hbm %s2272_s1, 16384 }
  0x12   : > { %p2072_p11 = pnand %p1615_p9, %p2275_p1  ;;  %p1863_p12 = scmp.ne.s32.totalorder %s2272_s1, %s1862_s29 }
  0x13   : > { %p1869_p5 = scmp.lt.u32.totalorder %s1862_s29, %s2272_s1 }
  0x14   : > { %p1864_p13 = pneg %p2072_p11 }
  0x16   : > { %p1865_p0 = pnand %p1864_p13, %p1863_p12 }
  0x18   : > { %p1866_p3 = pneg %p1865_p0 }
  0x1a   : > { %p1871_p7 = pnand %p1869_p5, %p1866_p3 }
  0x1c   : > { %1874 = shalt.err (!%p1871_p7)
}
  0x1d   : > { %s1875_s7 = scalar_lea.vmem %s2065_s22, 16384  ;;  %p1883_p2 = scmp.lt.s32.totalorder %s2065_s22, %s2065_s22 }
  0x1e   : > { %p1876_p9 = scmp.ne.s32.totalorder %s2065_s22, %s1875_s7  ;;  %p1884_p6 = scmp.lt.s32.totalorder %s1875_s7, %s1875_s7 }
  0x20   : > { %p1878_p10 = pnand %p1876_p9, %p1864_p13  ;;  %p1885_p4 = por %p1884_p6, %p1883_p2 }
  0x22   : > { %p1879_p1 = pneg %p1878_p10 }
  0x24   : > { %p1886_p8 = pnand %p1885_p4, %p1879_p1 }
  0x26   : > { %1889 = shalt.err (!%p1886_p8)
}
  0x27   : > { %s1993_s8 = smov 128   ;;  %s1994_s9 = smov 8  }
  0x28   : > { %1618 = dma.hbm_to_vmem [thread:$0]  (!%p2072_p11), %s2272_s1, 16384, %s2065_s22, [#allocation6], %s1993_s8, %s1993_s8, %s1994_s9  }
  0x29   : > { %p25_p2 = scmp.eq.s32.totalorder %s24_s26, 0  ;;  %p34_p1 = scmp.ne.s32.totalorder %s1986_s14, %s1982_s13 }
  0x2a   : > { %p35_p4 = scmp.eq.s32.totalorder %s1990_s15, 0  ;;  %p1628_p6 = scmp.lt.s32.totalorder %s1990_s15, 2 }
  0x2b   : > { %s2108_s17 = scalar_select %p25_p2, %s1986_s14, %s27_s25  }
  0x2c   : > { %p36_p8 = por %p35_p4, %p34_p1  ;;  %p2282_p10 = scmp.eq.s32.totalorder %s2042_s16, 1 }
  0x2d   : > { %s148_s27 = sand.u32 1, %s1986_s14   ;;  %s1572_s28 = sshll.u32 %s1990_s15, 11 }
  0x2e   : > { %p2112_p12 = por %p2282_p10, %p34_p1  ;;  %s1413_s29 = sshll.u32 %s148_s27, 7 }
  0x2f   : > { %s2121_s4 = scalar_lea.hbm %s2271_s0, %s1572_s28  ;;  %s152_s22 = scalar_lea.vmem [#allocation2], %s1413_s29 }
  0x30   : > { %s160_s25 = sshll.u32 %s152_s22, 4  ;;  %p2123_p11 = pnand %p1628_p6, %p36_p8  ;;  %s2127_s25 = int_to_ptr.vmem [resolvable:$true] %s160_s25 }
  0x31   : > { %s2129_s5 = scalar_lea.sflag [#allocation3], %s148_s27  ;;  %s1890_s6 = scalar_lea.hbm %s2121_s4, 2048 }
  0x32   : > { %p1891_p13 = scmp.ne.s32.totalorder %s2121_s4, %s1890_s6  ;;  %p1892_p0 = pneg %p2123_p11 }
  0x33   : > { %s1895_s9 = scalar_lea.hbm %s2271_s0, 4096  ;;  %p1896_p7 = scmp.lt.u32.totalorder %s2121_s4, %s2271_s0 }
  0x34   : > { %p1893_p3 = pnand %p1892_p0, %p1891_p13  ;;  %p1897_p9 = scmp.lt.u32.totalorder %s1895_s9, %s1890_s6 }
  0x35   : > { %p1899_p1 = scmp.lt.u32.totalorder %s1890_s6, %s2121_s4 }
  0x36   : > { %p1894_p5 = pneg %p1893_p3  ;;  %p1898_p2 = por %p1897_p9, %p1896_p7 }
  0x38   : > { %p1900_p4 = por %p1899_p1, %p1898_p2 }
  0x3a   : > { %p1901_p6 = pnand %p1900_p4, %p1894_p5 }
  0x3c   : > { %1904 = shalt.err (!%p1901_p6)
}
  0x3d   : > { %s1905_s27 = scalar_lea.vmem %s2127_s25, 2048  ;;  %s1995_s28 = smov [#allocation2]  }
  0x3e   : > { %p1906_p8 = scmp.ne.s32.totalorder %s2127_s25, %s1905_s27  ;;  %s1910_s29 = sshll.u32 %s1995_s28, 4  ;;  %s1911_s29 = int_to_ptr.vmem [resolvable:$false] %s1910_s29 }
  0x3f   : > { %s1912_s23 = scalar_lea.vmem %s1911_s29, 4096  ;;  %p1913_p3 = scmp.lt.s32.totalorder %s2127_s25, %s1911_s29 }
  0x40   : > { %p1908_p10 = pnand %p1906_p8, %p1892_p0  ;;  %p1914_p7 = scmp.lt.s32.totalorder %s1912_s23, %s1905_s27 }
  0x42   : > { %p1909_p13 = pneg %p1908_p10  ;;  %p1915_p9 = por %p1914_p7, %p1913_p3 }
  0x44   : > { %p1916_p2 = pnand %p1915_p9, %p1909_p13 }
  0x46   : > { %1919 = shalt.err (!%p1916_p2)
}
  0x47   : > { %s1996_s30 = smov 512   ;;  %s1997_s22 = smov 32  }
  0x48   : > { %1622 = dma.hbm_to_vmem [thread:$0]  (!%p2123_p11), %s2121_s4, 2048, %s2127_s25, %s2129_s5, %s1996_s30, %s1996_s30, %s1997_s22  }
  0x49   : > { %p2285_p0 = scmp.ne.s32.totalorder %s2280_s20, 0 }
  0x4a   : > { %s2160_s6 = sand.u32 (!%p2285_p0), 1, %s1982_s13   ;;  %p2286_p5 = scmp.ne.s32.totalorder (!%p2285_p0), %s2278_s18, 0 }
  0x4b   : > { %172 = sbr.rel (%p2285_p0) target bundleno = 459 (0x1cb), region = 32  ;;  %s1418_s7 = sshll.u32 (!%p2285_p0), %s2160_s6, 7 }
  0x4c   : > { %s175_s8 = scalar_lea.sflag (!%p2285_p0), [#allocation3], %s2160_s6  ;;  %s2164_s9 = scalar_lea.vmem (!%p2285_p0), [#allocation2], %s1418_s7 }
  0x52   : > { %1965 = dma.done.wait (%p2286_p5), %s175_s8, 2048  }
  0x53   : > { %1967 = vsyncadd (%p2286_p5), %s175_s8, 4294965248  ;;  %p2287_p11 = scmp.eq.s32.totalorder %s2042_s16, 0 }
  0x55   : > { %1969 = dma.done.wait (%p2287_p11), [#allocation6], 16384   ;;  %p2288_p1 = pmov %p2287_p11 }
  0x56   : > { %v1670_v0 = vld [vmem:[#allocation5 + $0x4] ss:$8 sps:$4 sm:$0xff]   ;;  %v1674_v2 = vld [vmem:[#allocation5] ss:$8 sps:$4 sm:$0xff]   ;;  %v1676_v4 = vld [vmem:[#allocation5 + $0x14] ss:$8 sps:$4 sm:$0xff]  }
  0x57   : > { %1971 = vsyncadd (%p2288_p1), [#allocation6], 4294950912  ;;  %v1672_v1 = vld [vmem:[#allocation5 + $0x204] ss:$8 sps:$4 sm:$0xff]   ;;  %1083 = vmatprep.subr.bf16.mxu1 %v1670_v0  ;;  %v1675_v3 = vld [vmem:[#allocation5 + $0x200] ss:$8 sps:$4 sm:$0xff]  }
  0x58   : > { %1189 = vmatprep.subr.bf16.mxu0 %v1672_v1  ;;  %1084 = vmatpush1.bf16.msra.mxu1 %v1674_v2  ;;  %v1678_v5 = vld [vmem:[#allocation5 + $0x214] ss:$8 sps:$4 sm:$0xff]   ;;  %v1680_v6 = vld [vmem:[#allocation5 + $0x10] ss:$8 sps:$4 sm:$0xff]   ;;  %v1682_v8 = vld [vmem:[#allocation5 + $0x24] ss:$8 sps:$4 sm:$0xff]  }
  0x59   : > { %1190 = vmatpush1.bf16.msra.mxu0 %v1675_v3  ;;  %1085 = vmatprep.subr.bf16.mxu1 %v1676_v4  ;;  %v1681_v7 = vld [vmem:[#allocation5 + $0x210] ss:$8 sps:$4 sm:$0xff]   ;;  %v1684_v9 = vld [vmem:[#allocation5 + $0x224] ss:$8 sps:$4 sm:$0xff]   ;;  %v1686_v10 = vld [vmem:[#allocation5 + $0x20] ss:$8 sps:$4 sm:$0xff]  }
  0x5a   : > { %1191 = vmatprep.subr.bf16.mxu0 %v1678_v5  ;;  %v1687_v11 = vld [vmem:[#allocation5 + $0x220] ss:$8 sps:$4 sm:$0xff]   ;;  %v1688_v12 = vld [vmem:[#allocation5 + $0x34] ss:$8 sps:$4 sm:$0xff]   ;;  %v1692_v14 = vld [vmem:[#allocation5 + $0x30] ss:$8 sps:$4 sm:$0xff]  }
  0x5b   : > { %v1690_v13 = vld [vmem:[#allocation5 + $0x234] ss:$8 sps:$4 sm:$0xff]   ;;  %v1693_v15 = vld [vmem:[#allocation5 + $0x230] ss:$8 sps:$4 sm:$0xff]   ;;  %v1694_v16 = vld [vmem:[#allocation5 + $0x44] ss:$8 sps:$4 sm:$0xff]  }
  0x5c   : > { %1086 = vmatpush1.bf16.msra.mxu1 %v1680_v6  ;;  %v1696_v17 = vld [vmem:[#allocation5 + $0x244] ss:$8 sps:$4 sm:$0xff]   ;;  %v1698_v18 = vld [vmem:[#allocation5 + $0x40] ss:$8 sps:$4 sm:$0xff]   ;;  %v1700_v20 = vld [vmem:[#allocation5 + $0x54] ss:$8 sps:$4 sm:$0xff]  }
  0x5d   : > { %1192 = vmatpush1.bf16.msra.mxu0 %v1681_v7  ;;  %1087 = vmatprep.subr.bf16.mxu1 %v1682_v8  ;;  %v1699_v19 = vld [vmem:[#allocation5 + $0x240] ss:$8 sps:$4 sm:$0xff]   ;;  %v1702_v21 = vld [vmem:[#allocation5 + $0x254] ss:$8 sps:$4 sm:$0xff]   ;;  %v1704_v22 = vld [vmem:[#allocation5 + $0x50] ss:$8 sps:$4 sm:$0xff]  }
  0x5e   : > { %1193 = vmatprep.subr.bf16.mxu0 %v1684_v9  ;;  %v1705_v23 = vld [vmem:[#allocation5 + $0x250] ss:$8 sps:$4 sm:$0xff]   ;;  %v1706_v24 = vld [vmem:[#allocation5 + $0x64] ss:$8 sps:$4 sm:$0xff]   ;;  %v1710_v26 = vld [vmem:[#allocation5 + $0x60] ss:$8 sps:$4 sm:$0xff]  }
  0x5f   : > { %v1708_v25 = vld [vmem:[#allocation5 + $0x264] ss:$8 sps:$4 sm:$0xff]   ;;  %v1711_v27 = vld [vmem:[#allocation5 + $0x260] ss:$8 sps:$4 sm:$0xff]   ;;  %v1712_v28 = vld [vmem:[#allocation5 + $0x74] ss:$8 sps:$4 sm:$0xff]  }
  0x60   : > { %1088 = vmatpush1.bf16.msra.mxu1 %v1686_v10  ;;  %v1714_v29 = vld [vmem:[#allocation5 + $0x274] ss:$8 sps:$4 sm:$0xff]   ;;  %v1716_v30 = vld [vmem:[#allocation5 + $0x70] ss:$8 sps:$4 sm:$0xff]   ;;  %v1718_v32 = vld [vmem:[#allocation5 + $0x84] ss:$8 sps:$4 sm:$0xff]  }
  0x61   : > { %1194 = vmatpush1.bf16.msra.mxu0 %v1687_v11  ;;  %1089 = vmatprep.subr.bf16.mxu1 %v1688_v12  ;;  %v1717_v31 = vld [vmem:[#allocation5 + $0x270] ss:$8 sps:$4 sm:$0xff]   ;;  %v1720_v33 = vld [vmem:[#allocation5 + $0x284] ss:$8 sps:$4 sm:$0xff]   ;;  %v1722_v34 = vld [vmem:[#allocation5 + $0x80] ss:$8 sps:$4 sm:$0xff]  }
  0x62   : > { %1195 = vmatprep.subr.bf16.mxu0 %v1690_v13  ;;  %v1723_v35 = vld [vmem:[#allocation5 + $0x280] ss:$8 sps:$4 sm:$0xff]   ;;  %v1724_v36 = vld [vmem:[#allocation5 + $0x94] ss:$8 sps:$4 sm:$0xff]   ;;  %v1728_v38 = vld [vmem:[#allocation5 + $0x90] ss:$8 sps:$4 sm:$0xff]  }
  0x63   : > { %v1726_v37 = vld [vmem:[#allocation5 + $0x294] ss:$8 sps:$4 sm:$0xff]   ;;  %v1729_v39 = vld [vmem:[#allocation5 + $0x290] ss:$8 sps:$4 sm:$0xff]   ;;  %v1730_v40 = vld [vmem:[#allocation5 + $0xa4] ss:$8 sps:$4 sm:$0xff]  }
  0x64   : > { %1090 = vmatpush1.bf16.msra.mxu1 %v1692_v14  ;;  %v1732_v41 = vld [vmem:[#allocation5 + $0x2a4] ss:$8 sps:$4 sm:$0xff]   ;;  %v1734_v42 = vld [vmem:[#allocation5 + $0xa0] ss:$8 sps:$4 sm:$0xff]   ;;  %v1736_v44 = vld [vmem:[#allocation5 + $0xb4] ss:$8 sps:$4 sm:$0xff]  }
  0x65   : > { %1196 = vmatpush1.bf16.msra.mxu0 %v1693_v15  ;;  %1091 = vmatprep.subr.bf16.mxu1 %v1694_v16  ;;  %v1735_v43 = vld [vmem:[#allocation5 + $0x2a0] ss:$8 sps:$4 sm:$0xff]   ;;  %v1738_v45 = vld [vmem:[#allocation5 + $0x2b4] ss:$8 sps:$4 sm:$0xff]   ;;  %v1740_v46 = vld [vmem:[#allocation5 + $0xb0] ss:$8 sps:$4 sm:$0xff]  }
  0x66   : > { %1197 = vmatprep.subr.bf16.mxu0 %v1696_v17  ;;  %v1741_v47 = vld [vmem:[#allocation5 + $0x2b0] ss:$8 sps:$4 sm:$0xff]   ;;  %v207_v48 = vld [vmem:[%s2164_s9] sm:$0xff]  ;;  %v1748_v58 = vld [vmem:[#allocation5 + $0xd4] ss:$8 sps:$4 sm:$0xff]   ;;  %s1420_s4 = sshll.u32 %s2160_s6, 6 }
  0x67   : > { %v211_v49 = vld [vmem:[%s2164_s9 + $0x20] sm:$0xff]  ;;  %v209_v53 = vld [vmem:[%s2164_s9 + $0x10] sm:$0xff]  ;;  %s2210_s25 = scalar_lea.vmem [#allocation7], %s1420_s4  ;;  %s1574_s5 = sshll.u32 %s2042_s16, 10 }
  0x68   : > { %1092 = vmatpush1.bf16.msra.mxu1 %v1698_v18  ;;  %v1742_v50 = vld [vmem:[#allocation5 + $0xc4] ss:$8 sps:$4 sm:$0xff]   ;;  %v1422_v52 = vcombine.high %v207_v48, %v211_v49  ;;  %v213_v54 = vld [vmem:[%s2164_s9 + $0x30] sm:$0xff]  ;;  %v1746_v56 = vld [vmem:[#allocation5 + $0xc0] ss:$8 sps:$4 sm:$0xff]   ;;  %v1421_v8 = vcombine.low %v207_v48, %v211_v49  ;;  %s1326_s26 = sshll.u32 %s2210_s25, 4  ;;  %s2224_s27 = scalar_lea.hbm %s2274_s3, %s1574_s5  ;;  %s2218_s26 = int_to_ptr.vmem [resolvable:$true] %s1326_s26 }
  0x69   : > { %1198 = vmatpush1.bf16.msra.mxu0 %v1699_v19  ;;  %1093 = vmatprep.subr.bf16.mxu1 %v1700_v20  ;;  %v1744_v51 = vld [vmem:[#allocation5 + $0x2c4] ss:$8 sps:$4 sm:$0xff]   ;;  %v1426_v55 = vcombine.high %v209_v53, %v213_v54  ;;  %v1747_v57 = vld [vmem:[#allocation5 + $0x2c0] ss:$8 sps:$4 sm:$0xff]   ;;  %v1750_v59 = vld [vmem:[#allocation5 + $0x2d4] ss:$8 sps:$4 sm:$0xff]   ;;  %v1425_v10 = vcombine.low %v209_v53, %v213_v54 }
  0x6a   : > { %1199 = vmatprep.subr.bf16.mxu0 %v1702_v21  ;;  %1115 = vmatprep.mubr.bf16.mxu1 %v1422_v52  ;;  %v1752_v60 = vld [vmem:[#allocation5 + $0xd0] ss:$8 sps:$4 sm:$0xff]   ;;  %v1754_v62 = vld [vmem:[#allocation5 + $0xe4] ss:$8 sps:$4 sm:$0xff]   ;;  %v1758_v0 = vld [vmem:[#allocation5 + $0xe0] ss:$8 sps:$4 sm:$0xff]  }
  0x6b   : > { %1221 = vmatprep.mubr.bf16.mxu0 %v1426_v55  ;;  %v1753_v61 = vld [vmem:[#allocation5 + $0x2d0] ss:$8 sps:$4 sm:$0xff]   ;;  %v1756_v63 = vld [vmem:[#allocation5 + $0x2e4] ss:$8 sps:$4 sm:$0xff]   ;;  %v1759_v1 = vld [vmem:[#allocation5 + $0x2e0] ss:$8 sps:$4 sm:$0xff]  }
  0x6c   : > { %1094 = vmatpush1.bf16.msra.mxu1 %v1704_v22  ;;  %v1760_v2 = vld [vmem:[#allocation5 + $0xf4] ss:$8 sps:$4 sm:$0xff]   ;;  %v1764_v4 = vld [vmem:[#allocation5 + $0xf0] ss:$8 sps:$4 sm:$0xff]   ;;  %v1768_v6 = vld [vmem:[#allocation5 + $0x104] ss:$8 sps:$4 sm:$0xff]  }
  0x6d   : > { %1200 = vmatpush1.bf16.msra.mxu0 %v1705_v23  ;;  %1095 = vmatprep.subr.bf16.mxu1 %v1706_v24  ;;  %v1762_v3 = vld [vmem:[#allocation5 + $0x2f4] ss:$8 sps:$4 sm:$0xff]   ;;  %v1765_v5 = vld [vmem:[#allocation5 + $0x2f0] ss:$8 sps:$4 sm:$0xff]   ;;  %v1771_v7 = vld [vmem:[#allocation5 + $0x304] ss:$8 sps:$4 sm:$0xff]  }
  0x6e   : > { %1201 = vmatprep.subr.bf16.mxu0 %v1708_v25  ;;  %v1766_v9 = vld [vmem:[#allocation5 + $0x100] ss:$8 sps:$4 sm:$0xff]   ;;  %v1774_v12 = vld [vmem:[#allocation5 + $0x114] ss:$8 sps:$4 sm:$0xff]   ;;  %v1772_v14 = vld [vmem:[#allocation5 + $0x110] ss:$8 sps:$4 sm:$0xff]  }
  0x6f   : > { %v1769_v11 = vld [vmem:[#allocation5 + $0x300] ss:$8 sps:$4 sm:$0xff]   ;;  %v1777_v13 = vld [vmem:[#allocation5 + $0x314] ss:$8 sps:$4 sm:$0xff]   ;;  %v1775_v15 = vld [vmem:[#allocation5 + $0x310] ss:$8 sps:$4 sm:$0xff]  }
  0x70   : > { %1096 = vmatpush1.bf16.msra.mxu1 %v1710_v26  ;;  %v1780_v16 = vld [vmem:[#allocation5 + $0x124] ss:$8 sps:$4 sm:$0xff]   ;;  %v1778_v18 = vld [vmem:[#allocation5 + $0x120] ss:$8 sps:$4 sm:$0xff]   ;;  %v1786_v20 = vld [vmem:[#allocation5 + $0x134] ss:$8 sps:$4 sm:$0xff]  }
  0x71   : > { %1202 = vmatpush1.bf16.msra.mxu0 %v1711_v27  ;;  %1097 = vmatprep.subr.bf16.mxu1 %v1712_v28  ;;  %v1783_v17 = vld [vmem:[#allocation5 + $0x324] ss:$8 sps:$4 sm:$0xff]   ;;  %v1781_v19 = vld [vmem:[#allocation5 + $0x320] ss:$8 sps:$4 sm:$0xff]   ;;  %v1789_v21 = vld [vmem:[#allocation5 + $0x334] ss:$8 sps:$4 sm:$0xff]  }
  0x72   : > { %1203 = vmatprep.subr.bf16.mxu0 %v1714_v29  ;;  %v1784_v22 = vld [vmem:[#allocation5 + $0x130] ss:$8 sps:$4 sm:$0xff]   ;;  %v1792_v24 = vld [vmem:[#allocation5 + $0x144] ss:$8 sps:$4 sm:$0xff]   ;;  %v1790_v26 = vld [vmem:[#allocation5 + $0x140] ss:$8 sps:$4 sm:$0xff]  }
  0x73   : > { %v1787_v23 = vld [vmem:[#allocation5 + $0x330] ss:$8 sps:$4 sm:$0xff]   ;;  %v1795_v25 = vld [vmem:[#allocation5 + $0x344] ss:$8 sps:$4 sm:$0xff]   ;;  %v1793_v27 = vld [vmem:[#allocation5 + $0x340] ss:$8 sps:$4 sm:$0xff]  }
  0x74   : > { %1098 = vmatpush1.bf16.msra.mxu1 %v1716_v30  ;;  %v1798_v28 = vld [vmem:[#allocation5 + $0x154] ss:$8 sps:$4 sm:$0xff]   ;;  %v215_v30 = vld [vmem:[%s2164_s9 + $0x40] sm:$0xff]  ;;  %v1808_v52 = vld [vmem:[#allocation5 + $0x170] ss:$8 sps:$4 sm:$0xff]   ;;  %s1312_s16 = scalar_lea.sflag [#allocation4], %s2160_s6 }
  0x75   : > { %1204 = vmatpush1.bf16.msra.mxu0 %v1717_v31  ;;  %1099 = vmatprep.subr.bf16.mxu1 %v1718_v32  ;;  %v1801_v29 = vld [vmem:[#allocation5 + $0x354] ss:$8 sps:$4 sm:$0xff]   ;;  %v219_v31 = vld [vmem:[%s2164_s9 + $0x60] sm:$0xff]  ;;  %v1811_v53 = vld [vmem:[#allocation5 + $0x370] ss:$8 sps:$4 sm:$0xff]   ;;  %s1920_s28 = scalar_lea.vmem %s2218_s26, 1024 }
  0x76   : > { %1205 = vmatprep.subr.bf16.mxu0 %v1720_v33  ;;  %v1430_v32 = vcombine.high %v215_v30, %v219_v31  ;;  %v217_v33 = vld [vmem:[%s2164_s9 + $0x50] sm:$0xff]  ;;  %v1816_v54 = vld [vmem:[#allocation5 + $0x184] ss:$8 sps:$4 sm:$0xff]   ;;  %p1921_p4 = scmp.ne.s32.totalorder %s2218_s26, %s1920_s28  ;;  %s1998_s29 = smov [#allocation7]  }
  0x77   : > { %v1813_v48 = vld [vmem:[#allocation5 + $0x374] ss:$8 sps:$4 sm:$0xff]   ;;  %v1819_v55 = vld [vmem:[#allocation5 + $0x384] ss:$8 sps:$4 sm:$0xff]   ;;  %s1924_s23 = sshll.u32 %s1998_s29, 4  ;;  %s1925_s23 = int_to_ptr.vmem [resolvable:$false] %s1924_s23 }
  0x78   : > { %1100 = vmatpush1.bf16.msra.mxu1 %v1722_v34  ;;  %v221_v34 = vld [vmem:[%s2164_s9 + $0x70] sm:$0xff]  ;;  %p1922_p6 = pnand %p1921_p4, %p2112_p12  ;;  %s1926_s30 = scalar_lea.vmem %s1925_s23, 2048 }
  0x79   : > { %1206 = vmatpush1.bf16.msra.mxu0 %v1723_v35  ;;  %1101 = vmatprep.subr.bf16.mxu1 %v1724_v36  ;;  %v1796_v35 = vld [vmem:[#allocation5 + $0x150] ss:$8 sps:$4 sm:$0xff]   ;;  %p1927_p10 = scmp.lt.s32.totalorder %s2218_s26, %s1925_s23  ;;  %p1928_p13 = scmp.lt.s32.totalorder %s1926_s30, %s1920_s28 }
  0x7a   : > { %1207 = vmatprep.subr.bf16.mxu0 %v1726_v37  ;;  %v1799_v36 = vld [vmem:[#allocation5 + $0x350] ss:$8 sps:$4 sm:$0xff]   ;;  %v1434_v37 = vcombine.high %v217_v33, %v221_v34  ;;  %p1923_p8 = pneg %p1922_p6 }
  0x7b   : > { %p1929_p3 = por %p1928_p13, %p1927_p10 }
  0x7c   : > { %1102 = vmatpush1.bf16.msra.mxu1 %v1728_v38  ;;  %v1429_v38 = vcombine.low %v215_v30, %v219_v31 }
  0x7d   : > { %1208 = vmatpush1.bf16.msra.mxu0 %v1729_v39  ;;  %1103 = vmatprep.subr.bf16.mxu1 %v1730_v40  ;;  %v1433_v39 = vcombine.low %v217_v33, %v221_v34  ;;  %v1804_v40 = vld [vmem:[#allocation5 + $0x164] ss:$8 sps:$4 sm:$0xff]   ;;  %p1930_p7 = pnand %p1929_p3, %p1923_p8 }
  0x7e   : > { %1209 = vmatprep.subr.bf16.mxu0 %v1732_v41  ;;  %v1807_v41 = vld [vmem:[#allocation5 + $0x364] ss:$8 sps:$4 sm:$0xff]  }
  0x80   : > { %1104 = vmatpush1.bf16.msra.mxu1 %v1734_v42  ;;  %v1802_v42 = vld [vmem:[#allocation5 + $0x160] ss:$8 sps:$4 sm:$0xff]  }
  0x81   : > { %1210 = vmatpush1.bf16.msra.mxu0 %v1735_v43  ;;  %1105 = vmatprep.subr.bf16.mxu1 %v1736_v44  ;;  %v1805_v43 = vld [vmem:[#allocation5 + $0x360] ss:$8 sps:$4 sm:$0xff]  }
  0x82   : > { %1211 = vmatprep.subr.bf16.mxu0 %v1738_v45  ;;  %v2183_v44 = vld [vmem:[%s2164_s9 + $0x8] sm:$0xff] }
  0x83   : > { %v2186_v45 = vld [vmem:[%s2164_s9 + $0x28] sm:$0xff] }
  0x84   : > { %1106 = vmatpush1.bf16.msra.mxu1 %v1740_v46  ;;  %v2189_v46 = vld [vmem:[%s2164_s9 + $0x18] sm:$0xff]  ;;  %v1424_v49 = vcombine.high %v2183_v44, %v2186_v45 }
  0x85   : > { %1212 = vmatpush1.bf16.msra.mxu0 %v1741_v47  ;;  %1107 = vmatprep.subr.bf16.mxu1 %v1742_v50  ;;  %v1810_v47 = vld [vmem:[#allocation5 + $0x174] ss:$8 sps:$4 sm:$0xff]  }
  0x86   : > { %1213 = vmatprep.subr.bf16.mxu0 %v1744_v51  ;;  %v2194_v50 = vld [vmem:[%s2164_s9 + $0x38] sm:$0xff] }
  0x87   : > { %v1428_v51 = vcombine.high %v2189_v46, %v2194_v50 }
  0x88   : > { %1108 = vmatpush1.bf16.msra.mxu1 %v1746_v56  ;;  %v1814_v56 = vld [vmem:[#allocation5 + $0x180] ss:$8 sps:$4 sm:$0xff]  }
  0x89   : > { %1214 = vmatpush1.bf16.msra.mxu0 %v1747_v57  ;;  %1109 = vmatprep.subr.bf16.mxu1 %v1748_v58  ;;  %v1817_v57 = vld [vmem:[#allocation5 + $0x380] ss:$8 sps:$4 sm:$0xff]   ;;  %v1822_v58 = vld [vmem:[#allocation5 + $0x194] ss:$8 sps:$4 sm:$0xff]  }
  0x8a   : > { %1215 = vmatprep.subr.bf16.mxu0 %v1750_v59  ;;  %v1825_v59 = vld [vmem:[#allocation5 + $0x394] ss:$8 sps:$4 sm:$0xff]  }
  0x8c   : > { %1110 = vmatpush1.bf16.msra.mxu1 %v1752_v60  ;;  %v1820_v60 = vld [vmem:[#allocation5 + $0x190] ss:$8 sps:$4 sm:$0xff]  }
  0x8d   : > { %1216 = vmatpush1.bf16.msra.mxu0 %v1753_v61  ;;  %1111 = vmatprep.subr.bf16.mxu1 %v1754_v62  ;;  %v1823_v61 = vld [vmem:[#allocation5 + $0x390] ss:$8 sps:$4 sm:$0xff]   ;;  %v1828_v62 = vld [vmem:[#allocation5 + $0x1a4] ss:$8 sps:$4 sm:$0xff]  }
  0x8e   : > { %1217 = vmatprep.subr.bf16.mxu0 %v1756_v63  ;;  %v1831_v63 = vld [vmem:[#allocation5 + $0x3a4] ss:$8 sps:$4 sm:$0xff]  }
  0x90   : > { %1112 = vmatpush1.bf16.msra.mxu1 %v1758_v0  ;;  %v1826_v0 = vld [vmem:[#allocation5 + $0x1a0] ss:$8 sps:$4 sm:$0xff]  }
  0x91   : > { %1218 = vmatpush1.bf16.msra.mxu0 %v1759_v1  ;;  %1113 = vmatprep.subr.bf16.mxu1 %v1760_v2  ;;  %v1829_v1 = vld [vmem:[#allocation5 + $0x3a0] ss:$8 sps:$4 sm:$0xff]   ;;  %v1834_v2 = vld [vmem:[#allocation5 + $0x1b4] ss:$8 sps:$4 sm:$0xff]  }
  0x92   : > { %1219 = vmatprep.subr.bf16.mxu0 %v1762_v3  ;;  %v1837_v3 = vld [vmem:[#allocation5 + $0x3b4] ss:$8 sps:$4 sm:$0xff]  }
  0x94   : > { %1114 = vmatpush1.bf16.msra.mxu1 %v1764_v4  ;;  %v1832_v4 = vld [vmem:[#allocation5 + $0x1b0] ss:$8 sps:$4 sm:$0xff]  }
  0x95   : > { %1220 = vmatpush1.bf16.msra.mxu0 %v1765_v5  ;;  %1136 = vmatprep.subr.bf16.mxu1 %v1768_v6  ;;  %v1835_v5 = vld [vmem:[#allocation5 + $0x3b0] ss:$8 sps:$4 sm:$0xff]   ;;  %v1840_v6 = vld [vmem:[#allocation5 + $0x1c4] ss:$8 sps:$4 sm:$0xff]  }
  0x96   : > { %1242 = vmatprep.subr.bf16.mxu0 %v1771_v7  ;;  %v1843_v7 = vld [vmem:[#allocation5 + $0x3c4] ss:$8 sps:$4 sm:$0xff]  }
  0x97   : > { %1116 = vmatmul.mubr.bf16.vlgmr.msra.gmra.mrb[0].mxu1 %v1421_v8  ;;  %v1838_v8 = vld [vmem:[#allocation5 + $0x1c0] ss:$8 sps:$4 sm:$0xff]  }
  0x98   : > { %1222 = vmatmul.mubr.bf16.vlgmr.msra.gmra.mrb[0].mxu0 %v1425_v10  ;;  %1137 = vmatpush1.bf16.msra.mxu1 %v1766_v9  ;;  %v1841_v9 = vld [vmem:[#allocation5 + $0x3c0] ss:$8 sps:$4 sm:$0xff]   ;;  %v1846_v10 = vld [vmem:[#allocation5 + $0x1d4] ss:$8 sps:$4 sm:$0xff]  }
  0x99   : > { %1243 = vmatpush1.bf16.msra.mxu0 %v1769_v11  ;;  %1138 = vmatprep.subr.bf16.mxu1 %v1774_v12  ;;  %v1849_v11 = vld [vmem:[#allocation5 + $0x3d4] ss:$8 sps:$4 sm:$0xff]   ;;  %v1844_v12 = vld [vmem:[#allocation5 + $0x1d0] ss:$8 sps:$4 sm:$0xff]  }
  0x9a   : > { %1244 = vmatprep.subr.bf16.mxu0 %v1777_v13  ;;  %1125 = vmatprep.mubr.bf16.mxu1 %v1430_v32  ;;  %v1847_v13 = vld [vmem:[#allocation5 + $0x3d0] ss:$8 sps:$4 sm:$0xff]   ;;  %v353_v32 = vlaneseq }
  0x9b   : > { %1231 = vmatprep.mubr.bf16.mxu0 %v1434_v37 }
  0x9c   : > { %1139 = vmatpush1.bf16.msra.mxu1 %v1772_v14  ;;  %v1852_v14 = vld [vmem:[#allocation5 + $0x1e4] ss:$8 sps:$4 sm:$0xff]   ;;  %v354_v33 = vshrl.u32 %v353_v32, 7 }
  0x9d   : > { %1245 = vmatpush1.bf16.msra.mxu0 %v1775_v15  ;;  %1140 = vmatprep.subr.bf16.mxu1 %v1780_v16  ;;  %v1855_v15 = vld [vmem:[#allocation5 + $0x3e4] ss:$8 sps:$4 sm:$0xff]   ;;  %v1850_v16 = vld [vmem:[#allocation5 + $0x1e0] ss:$8 sps:$4 sm:$0xff]  }
  0x9e   : > { %1246 = vmatprep.subr.bf16.mxu0 %v1783_v17  ;;  %v1853_v17 = vld [vmem:[#allocation5 + $0x3e0] ss:$8 sps:$4 sm:$0xff]   ;;  %v355_v34 = vsub.s32 0, %v354_v33 }
  0x9f   : > { %1126 = vmatmul.mubr.bf16.gmra.mrb[4].mxu1 %v1429_v38 }
  0xa0   : > { %1141 = vmatpush1.bf16.msra.mxu1 %v1778_v18  ;;  %1232 = vmatmul.mubr.bf16.gmra.mrb[4].mxu0 %v1433_v39  ;;  %v1858_v18 = vld [vmem:[#allocation5 + $0x1f4] ss:$8 sps:$4 sm:$0xff]  }
  0xa1   : > { %1247 = vmatpush1.bf16.msra.mxu0 %v1781_v19  ;;  %1142 = vmatprep.subr.bf16.mxu1 %v1786_v20  ;;  %v1861_v19 = vld [vmem:[#allocation5 + $0x3f4] ss:$8 sps:$4 sm:$0xff]   ;;  %v1856_v20 = vld [vmem:[#allocation5 + $0x1f0] ss:$8 sps:$4 sm:$0xff]  }
  0xa2   : > { %1248 = vmatprep.subr.bf16.mxu0 %v1789_v21  ;;  %1168 = vmatprep.mubr.bf16.mxu1 %v1424_v49  ;;  %v1859_v21 = vld [vmem:[#allocation5 + $0x3f0] ss:$8 sps:$4 sm:$0xff]  }
  0xa3   : > { %1274 = vmatprep.mubr.bf16.mxu0 %v1428_v51 }
  0xa4   : > { %1143 = vmatpush1.bf16.msra.mxu1 %v1784_v22  ;;  %v216_v22 = vld [vmem:[%s2164_s9 + $0x48] sm:$0xff] }
  0xa5   : > { %1249 = vmatpush1.bf16.msra.mxu0 %v1787_v23  ;;  %1144 = vmatprep.subr.bf16.mxu1 %v1792_v24  ;;  %v220_v23 = vld [vmem:[%s2164_s9 + $0x68] sm:$0xff]  ;;  %v218_v24 = vld [vmem:[%s2164_s9 + $0x58] sm:$0xff] }
  0xa6   : > { %1250 = vmatprep.subr.bf16.mxu0 %v1795_v25  ;;  %v222_v25 = vld [vmem:[%s2164_s9 + $0x78] sm:$0xff]  ;;  %v1431_v30 = vcombine.low %v216_v22, %v220_v23 }
  0xa7   : > { %v1435_v31 = vcombine.low %v218_v24, %v222_v25 }
  0xa8   : > { %1145 = vmatpush1.bf16.msra.mxu1 %v1790_v26  ;;  %v1423_v26 = vcombine.low %v2183_v44, %v2186_v45 }
  0xa9   : > { %1251 = vmatpush1.bf16.msra.mxu0 %v1793_v27  ;;  %1146 = vmatprep.subr.bf16.mxu1 %v1798_v28  ;;  %v1427_v27 = vcombine.low %v2189_v46, %v2194_v50  ;;  %v1432_v28 = vcombine.high %v216_v22, %v220_v23 }
  0xaa   : > { %1252 = vmatprep.subr.bf16.mxu0 %v1801_v29  ;;  %v1436_v29 = vcombine.high %v218_v24, %v222_v25 }
  0xac   : > { %1147 = vmatpush1.bf16.msra.mxu1 %v1796_v35  ;;  %v351_v35 = vld [vmem:[%s2273_s2] sm:$0x3] }
  0xad   : > { %1253 = vmatpush1.bf16.msra.mxu0 %v1799_v36  ;;  %1148 = vmatprep.subr.bf16.mxu1 %v1804_v40  ;;  %v359_v36 = vsub.s32 1, %v354_v33  ;;  %v356_v37 = vrot.slane %v351_v35, %v355_v34 }
  0xae   : > { %1254 = vmatprep.subr.bf16.mxu0 %v1807_v41 }
  0xaf   : > { %v360_v38 = vrot.slane %v351_v35, %v359_v36 }
  0xb0   : > { %1149 = vmatpush1.bf16.msra.mxu1 %v1802_v42 }
  0xb1   : > { %1255 = vmatpush1.bf16.msra.mxu0 %v1805_v43  ;;  %1150 = vmatprep.subr.bf16.mxu1 %v1810_v47 }
  0xb2   : > { %1256 = vmatprep.subr.bf16.mxu0 %v1813_v48 }
  0xb4   : > { %1151 = vmatpush1.bf16.msra.mxu1 %v1808_v52 }
  0xb5   : > { %1257 = vmatpush1.bf16.msra.mxu0 %v1811_v53  ;;  %1152 = vmatprep.subr.bf16.mxu1 %v1816_v54 }
  0xb6   : > { %1258 = vmatprep.subr.bf16.mxu0 %v1819_v55 }
  0xb8   : > { %1153 = vmatpush1.bf16.msra.mxu1 %v1814_v56 }
  0xb9   : > { %1259 = vmatpush1.bf16.msra.mxu0 %v1817_v57  ;;  %1154 = vmatprep.subr.bf16.mxu1 %v1822_v58 }
  0xba   : > { %1260 = vmatprep.subr.bf16.mxu0 %v1825_v59 }
  0xbc   : > { %1155 = vmatpush1.bf16.msra.mxu1 %v1820_v60 }
  0xbd   : > { %1261 = vmatpush1.bf16.msra.mxu0 %v1823_v61  ;;  %1156 = vmatprep.subr.bf16.mxu1 %v1828_v62 }
  0xbe   : > { %1262 = vmatprep.subr.bf16.mxu0 %v1831_v63 }
  0xc0   : > { %1157 = vmatpush1.bf16.msra.mxu1 %v1826_v0 }
  0xc1   : > { %1263 = vmatpush1.bf16.msra.mxu0 %v1829_v1  ;;  %1158 = vmatprep.subr.bf16.mxu1 %v1834_v2 }
  0xc2   : > { %1264 = vmatprep.subr.bf16.mxu0 %v1837_v3 }
  0xc4   : > { %1159 = vmatpush1.bf16.msra.mxu1 %v1832_v4 }
  0xc5   : > { %1265 = vmatpush1.bf16.msra.mxu0 %v1835_v5  ;;  %1160 = vmatprep.subr.bf16.mxu1 %v1840_v6 }
  0xc6   : > { %1266 = vmatprep.subr.bf16.mxu0 %v1843_v7 }
  0xc8   : > { %1161 = vmatpush1.bf16.msra.mxu1 %v1838_v8 }
  0xc9   : > { %1267 = vmatpush1.bf16.msra.mxu0 %v1841_v9  ;;  %1162 = vmatprep.subr.bf16.mxu1 %v1846_v10 }
  0xca   : > { %1268 = vmatprep.subr.bf16.mxu0 %v1849_v11 }
  0xcc   : > { %1163 = vmatpush1.bf16.msra.mxu1 %v1844_v12 }
  0xcd   : > { %1269 = vmatpush1.bf16.msra.mxu0 %v1847_v13  ;;  %1164 = vmatprep.subr.bf16.mxu1 %v1852_v14 }
  0xce   : > { %1270 = vmatprep.subr.bf16.mxu0 %v1855_v15 }
  0xd0   : > { %1165 = vmatpush1.bf16.msra.mxu1 %v1850_v16 }
  0xd1   : > { %1271 = vmatpush1.bf16.msra.mxu0 %v1853_v17  ;;  %1166 = vmatprep.subr.bf16.mxu1 %v1858_v18 }
  0xd2   : > { %1272 = vmatprep.subr.bf16.mxu0 %v1861_v19 }
  0xd4   : > { %1167 = vmatpush1.bf16.msra.mxu1 %v1856_v20 }
  0xd5   : > { %1273 = vmatpush1.bf16.msra.mxu0 %v1859_v21 }
  0xd7   : > { %1169 = vmatmul.mubr.bf16.vlgmr.msra.gmra.mrb[0].mxu1 %v1423_v26 }
  0xd8   : > { %1275 = vmatmul.mubr.bf16.vlgmr.msra.gmra.mrb[0].mxu0 %v1427_v27  ;;  %1178 = vmatprep.mubr.bf16.mxu1 %v1432_v28 }
  0xd9   : > { %1284 = vmatprep.mubr.bf16.mxu0 %v1436_v29 }
  0xdf   : > { %1179 = vmatmul.mubr.bf16.gmra.mrb[4].mxu1 %v1431_v30 }
  0xe0   : > { %1285 = vmatmul.mubr.bf16.gmra.mrb[4].mxu0 %v1435_v31 }
 0x1aa   : > { %v1170_v39 = vpop.f32.mrb[0].mxu1 }
 0x1ab   : > { %v1276_v40 = vpop.f32.mrb[0].mxu0  ;;  %v1575_v41 = vadd.f32 %v1170_v39, %v356_v37  ;;  %v1172_v42 = vpop.f32.mrb[1].mxu1 }
 0x1ac   : > { %v1278_v43 = vpop.f32.mrb[1].mxu0  ;;  %v1577_v44 = vadd.f32 %v1172_v42, %v360_v38  ;;  %v1174_v45 = vpop.f32.mrb[2].mxu1 }
 0x1ad   : > { %v1280_v46 = vpop.f32.mrb[2].mxu0  ;;  %v1576_v47 = vadd.f32 %v1575_v41, %v1276_v40  ;;  %v1579_v48 = vadd.f32 %v1174_v45, %v356_v37  ;;  %v1176_v49 = vpop.f32.mrb[3].mxu1 }
 0x1ae   : > { %v1282_v50 = vpop.f32.mrb[3].mxu0  ;;  %v1578_v51 = vadd.f32 %v1577_v44, %v1278_v43  ;;  %v1581_v52 = vadd.f32 %v1176_v49, %v360_v38 }
 0x1af   : > { %v1295_v53 = vmax.f32 %v1576_v47, 0.0  ;;  %v1580_v54 = vadd.f32 %v1579_v48, %v1280_v46 }
 0x1b0   : > { %v1296_v55 = vmax.f32 %v1578_v51, 0.0  ;;  %v1582_v56 = vadd.f32 %v1581_v52, %v1282_v50 }
 0x1b1   : > { %1303 = vst [vmem:[%s2210_s25] sm:$0xff] %v1295_v53  ;;  %v1297_v57 = vmax.f32 %v1580_v54, 0.0 }
 0x1b2   : > { %1304 = vst [vmem:[%s2210_s25 + $0x8] sm:$0xff] %v1296_v55  ;;  %v1298_v58 = vmax.f32 %v1582_v56, 0.0  ;;  %v1180_v59 = vpop.f32.mrb[4].mxu1 }
 0x1b3   : > { %v1286_v60 = vpop.f32.mrb[4].mxu0  ;;  %1305 = vst [vmem:[%s2210_s25 + $0x10] sm:$0xff] %v1297_v57  ;;  %v1583_v61 = vadd.f32 %v1180_v59, %v356_v37  ;;  %v1182_v62 = vpop.f32.mrb[5].mxu1 }
 0x1b4   : > { %v1288_v63 = vpop.f32.mrb[5].mxu0  ;;  %1306 = vst [vmem:[%s2210_s25 + $0x18] sm:$0xff] %v1298_v58  ;;  %v1585_v0 = vadd.f32 %v1182_v62, %v360_v38  ;;  %v1184_v1 = vpop.f32.mrb[6].mxu1 }
 0x1b5   : > { %v1290_v2 = vpop.f32.mrb[6].mxu0  ;;  %v1584_v3 = vadd.f32 %v1583_v61, %v1286_v60  ;;  %v1587_v4 = vadd.f32 %v1184_v1, %v356_v37  ;;  %v1186_v5 = vpop.f32.mrb[7].mxu1 }
 0x1b6   : > { %v1292_v6 = vpop.f32.mrb[7].mxu0  ;;  %v1586_v7 = vadd.f32 %v1585_v0, %v1288_v63  ;;  %v1589_v8 = vadd.f32 %v1186_v5, %v360_v38 }
 0x1b7   : > { %v1299_v9 = vmax.f32 %v1584_v3, 0.0  ;;  %v1588_v10 = vadd.f32 %v1587_v4, %v1290_v2 }
 0x1b8   : > { %v1300_v11 = vmax.f32 %v1586_v7, 0.0  ;;  %v1590_v12 = vadd.f32 %v1589_v8, %v1292_v6 }
 0x1b9   : > { %1307 = vst [vmem:[%s2210_s25 + $0x20] sm:$0xff] %v1299_v9  ;;  %v1301_v13 = vmax.f32 %v1588_v10, 0.0 }
 0x1ba   : > { %1308 = vst [vmem:[%s2210_s25 + $0x28] sm:$0xff] %v1300_v11  ;;  %v1302_v14 = vmax.f32 %v1590_v12, 0.0 }
 0x1bb   : > { %1309 = vst [vmem:[%s2210_s25 + $0x30] sm:$0xff] %v1301_v13 }
 0x1bc   : > { %1310 = vst [vmem:[%s2210_s25 + $0x38] sm:$0xff] %v1302_v14 }
 0x1bd   : > { %1933 = shalt.err (!%p1930_p7)
}
 0x1be   : > { %s1934_s22 = scalar_lea.hbm %s2224_s27, 1024  ;;  %s1938_s9 = scalar_lea.hbm %s2274_s3, 2048 }
 0x1bf   : > { %p1935_p9 = scmp.ne.s32.totalorder %s2224_s27, %s1934_s22  ;;  %p1939_p5 = scmp.lt.u32.totalorder %s2224_s27, %s2274_s3 }
 0x1c0   : > { %p1940_p11 = scmp.lt.u32.totalorder %s1938_s9, %s1934_s22  ;;  %p1942_p4 = scmp.lt.u32.totalorder %s1934_s22, %s2224_s27 }
 0x1c1   : > { %p1936_p2 = pnand %p1935_p9, %p2112_p12 }
 0x1c2   : > { %p1941_p1 = por %p1940_p11, %p1939_p5 }
 0x1c3   : > { %p1937_p0 = pneg %p1936_p2 }
 0x1c4   : > { %p1943_p6 = por %p1942_p4, %p1941_p1 }
 0x1c6   : > { %p1944_p8 = pnand %p1943_p6, %p1937_p0 }
 0x1c8   : > { %1947 = shalt.err (!%p1944_p8)
}
 0x1c9   : > { %s1999_s4 = smov 256   ;;  %s2000_s25 = smov 16  }
 0x1ca   : > { %1613 = dma.vmem_to_hbm [thread:$0]  (%p2112_p12), %s2218_s26, 1024, %s2224_s27, %s1312_s16, %s1999_s4, %s1999_s4, %s2000_s25  }
 0x1cb PF: > { %s1341_s5 = sand.u32 1, %s1978_s12   ;;  %p2289_p10 = scmp.ne.s32.totalorder %s2279_s19, 0 }
 0x1cc   : > { %p2290_p13 = scmp.ge.s32.totalorder %s1990_s15, 2  ;;  %s1342_s10 = scalar_lea.sflag [#allocation4], %s1341_s5 }
 0x1ce   : > { %p1624_p3 = pnand %p2290_p13, %p2289_p10 }
 0x1d0   : > { %1973 = dma.done.wait (!%p1624_p3), %s1342_s10, 1024  }
 0x1d1   : > { %1975 = vsyncadd (!%p1624_p3), %s1342_s10, 4294966272  ;;  %p17_p7 = scmp.ge.s32.totalorder %s2077_s24, 4   ;;  %s2291_s12 = smov %s1982_s13 }
 0x1d2   : > { %s2292_s13 = smov %s1986_s14  ;;  %s2293_s14 = smov %s2108_s17 }
 0x1d3   : > { %s2294_s15 = smov %s2077_s24  ;;  %19 = sbr.rel (!%p17_p7) target bundleno = 6 (0x6), region = 81 }
 0x1da   :  { %1347 = vsyncpa [#allocation3], 1 }
 0x1db   :  { %1349 = vsyncpa [#allocation3 + $0x1], 1 }
 0x1dc   :  { %1350 = vsyncpa [#allocation6], 1 }
 0x1dd   :  { %1351 = vsyncpa [#allocation4], 1 }
 0x1de   :  { %1353 = vsyncpa [#allocation4 + $0x1], 1 }

</bundles_post_ra>
